<compile_context>
chip_gen: v5e
topology: v5e:2x2
jax: 0.10.0
libtpu: 0.0.40
codegen_flags: <defaults>
</compile_context>

<pallas_src>
import functools

import jax
import jax.numpy as jnp
from jax import lax
from jax.experimental import pallas as pl
from jax.experimental.pallas import tpu as pltpu

NUM_OPS = 8
_LANE = 128


def _round_up(x, m):
    return ((x + m - 1) // m) * m


def _pick_lane_tile(hw, c, elem, budget):
    """Lane tile: multiple of 128, sized so a tb=1 x-tile fits the byte budget."""
    hwp_min = _round_up(hw, _LANE)
    thw_budget = max(_LANE, (budget // max(1, c * elem)) // _LANE * _LANE)
    return min(hwp_min, thw_budget)


def _pick_batch_tile(b, c, thw, elem, budget):
    """Largest divisor of B that fits the budget and keeps >=2 parallel blocks."""
    cap = max(1, budget // max(1, c * thw * elem))          # x tile bytes
    cap = min(cap, max(1, budget // max(1, c * _LANE * 4)))  # acc scratch bytes
    if b < 2:
        return 1
    for t in range(min(b // 2, cap), 0, -1):
        if b % t == 0:
            return t
    return 1


def _const_spec(shape):
    """BlockSpec for a constant-index (grid-invariant) operand: single buffer."""
    index_map = lambda b, h: (0,) * len(shape)
    if hasattr(pl, "Buffered"):
        try:
            return pl.BlockSpec(shape, index_map, pipeline_mode=pl.Buffered(1))
        except TypeError:
            pass
    return pl.BlockSpec(shape, index_map)


def _expert_weight_gen_kernel(x_ref, w1_ref, b1_ref, w2_ref, b2_ref, o_ref,
                              acc_ref, *, inv_hw, n_chunks):
    # x_ref:  (TB, C, THW)    native dtype (f32 or bf16); THW = n_chunks * 128
    # w1_ref: (C,  H1p) f32   (in, out) layout, lane-padded
    # b1_ref: (1,  H1p) f32
    # w2_ref: (H1p, H2p) f32
    # b2_ref: (1,  H2p) f32
    # o_ref:  (TB, 1, H2p) f32
    # acc_ref:(TB, C, 128) f32 lane-resident pooled-sum accumulator
    hw_i = pl.program_id(1)

    @pl.when(hw_i == 0)
    def _init():
        acc_ref[...] = jnp.zeros_like(acc_ref)

    # Partial global-average-pool: pure vld + vadd per step (no cross-lane
    # reduce, no narrow stores) -- co-issues under the x DMA.
    def _chunk(c):
        return x_ref[:, :, c * _LANE:(c + 1) * _LANE].astype(jnp.float32)

    if n_chunks <= 16:
        partial = _chunk(0)
        for c in range(1, n_chunks):
            partial = partial + _chunk(c)
    else:
        def _body(c, part):
            off = pl.multiple_of(c * _LANE, _LANE)
            return part + x_ref[:, :, pl.ds(off, _LANE)].astype(jnp.float32)
        partial = lax.fori_loop(1, n_chunks, _body, _chunk(0))
    acc_ref[...] += partial

    @pl.when(hw_i == pl.num_programs(1) - 1)
    def _finalize():
        # Single cross-lane reduce + mean (zero padding adds nothing; inv_hw
        # uses the true H*W).
        pooled = jnp.sum(acc_ref[...], axis=-1) * inv_hw          # (TB, C)
        h = jnp.dot(pooled, w1_ref[...],
                    preferred_element_type=jnp.float32) + b1_ref[...]
        h = jnp.maximum(h, 0.0)                                    # ReLU
        out = jnp.dot(h, w2_ref[...],
                      preferred_element_type=jnp.float32) + b2_ref[...]
        o_ref[...] = out[:, None, :].astype(o_ref.dtype)


def expert_weight_gen(x_nchw, w1, b1, w2, b2, num_layers, *,
                      hw_tile=None, x_tile_budget_bytes=8 * 1024 * 1024,
                      x_dtype=None):
    """Forward pass of Expert_Weight_Gen.

    x_nchw: (B, C, H, W); w1: (C, H1); w2: (H1, H2) with H1 = 2*L*NUM_OPS,
    H2 = L*NUM_OPS.  Returns (B, num_layers, NUM_OPS) in float32.

    x_dtype: optionally cast the activation stream (e.g. jnp.bfloat16) --
    the kernel consumes x in its native dtype and widens in-kernel, so bf16
    halves the dominant HBM traffic on all generations.
    """
    B, C, H, W = x_nchw.shape
    HW = H * W
    x = x_nchw.reshape(B, C, HW)                 # contiguous view of NCHW
    if x_dtype is not None:
        x = x.astype(x_dtype)
    elem = x.dtype.itemsize

    H1 = w1.shape[1]
    H2 = w2.shape[1]
    H1p = _round_up(H1, _LANE)
    H2p = _round_up(H2, _LANE)
    f32 = jnp.float32

    # Zero-pad hidden dims to lane width (exact; see module docstring).
    w1p = jnp.zeros((C, H1p), f32).at[:, :H1].set(w1.astype(f32))
    b1p = jnp.zeros((1, H1p), f32).at[:, :H1].set(b1.astype(f32).reshape(1, H1))
    w2p = jnp.zeros((H1p, H2p), f32).at[:H1, :H2].set(w2.astype(f32))
    b2p = jnp.zeros((1, H2p), f32).at[:, :H2].set(b2.astype(f32).reshape(1, H2))

    budget = int(x_tile_budget_bytes)

    # --- HW (lane) tile; pad HW up to a multiple of it (exact, zeros add 0).
    if hw_tile is not None:
        assert hw_tile % _LANE == 0, "hw_tile must be a multiple of 128"
        thw = int(hw_tile)
    else:
        thw = _pick_lane_tile(HW, C, elem, budget)
    HWp = _round_up(HW, thw)
    n_hw = HWp // thw
    if HWp != HW:
        x = jnp.pad(x, ((0, 0), (0, 0), (0, HWp - HW)))

    # --- B tile: fill remaining budget but keep >=2 parallel blocks (v7x has
    #     2 TensorCores; costs nothing on 1-TC v5e/v6e).
    tb = _pick_batch_tile(B, C, thw, elem, budget)
    # TODO(synk): for B == 1 on v7x, additionally split HW on a leading
    # parallel axis (per-core partial sums combined in the wrapper) so both
    # TensorCores are used.

    grid = (B // tb, n_hw)
    n_chunks = thw // _LANE
    inv_hw = 1.0 / float(HW)

    # --- Explicit VMEM limit derived from the actual allocation (portable
    #     across the 16/32 MiB per-chip scoped defaults).
    x_tile_bytes = tb * C * thw * elem
    acc_bytes = tb * C * _LANE * 4
    w_bytes = (C * H1p + H1p + H1p * H2p + H2p) * 4
    out_blk_bytes = tb * H2p * 4
    vmem_limit = (2 * x_tile_bytes + acc_bytes + 2 * w_bytes
                  + 2 * out_blk_bytes + (4 << 20))
    vmem_limit = int(min(max(vmem_limit, 32 << 20), 96 << 20))

    flops = B * C * HW + 2 * B * C * H1 + 2 * B * H1 * H2
    bytes_accessed = B * C * HWp * elem + w_bytes + B * H2p * 4

    out = pl.pallas_call(
        functools.partial(_expert_weight_gen_kernel, inv_hw=inv_hw,
                          n_chunks=n_chunks),
        out_shape=jax.ShapeDtypeStruct((B, 1, H2p), f32),
        grid_spec=pltpu.PrefetchScalarGridSpec(
            num_scalar_prefetch=0,
            grid=grid,
            in_specs=[
                pl.BlockSpec((tb, C, thw), lambda b, h: (b, 0, h)),
                _const_spec((C, H1p)),
                _const_spec((1, H1p)),
                _const_spec((H1p, H2p)),
                _const_spec((1, H2p)),
            ],
            out_specs=pl.BlockSpec((tb, 1, H2p), lambda b, h: (b, 0, 0)),
            scratch_shapes=[pltpu.VMEM((tb, C, _LANE), jnp.float32)],
        ),
        compiler_params=pltpu.CompilerParams(
            dimension_semantics=("parallel", "arbitrary"),
            vmem_limit_bytes=vmem_limit),
        cost_estimate=pl.CostEstimate(
            flops=flops, transcendentals=0, bytes_accessed=bytes_accessed),
    )(x, w1p, b1p, w2p, b2p)

    return out[:, 0, :H2].reshape(B, num_layers, NUM_OPS)


def init_params(key, inputch, num_layers):
    """Deterministic parameter init matching the module's shapes.

    torch Linear weights are (out, in); stored transposed (in, out) for the
    row-vector @ matrix convention used by the kernel.
    """
    h1 = num_layers * NUM_OPS * 2
    h2 = num_layers * NUM_OPS
    k1, k2, k3, k4 = jax.random.split(key, 4)
    bound1 = 1.0 / (inputch ** 0.5)
    bound2 = 1.0 / (h1 ** 0.5)
    w1 = jax.random.uniform(k1, (inputch, h1), jnp.float32, -bound1, bound1)
    b1 = jax.random.uniform(k2, (h1,), jnp.float32, -bound1, bound1)
    w2 = jax.random.uniform(k3, (h1, h2), jnp.float32, -bound2, bound2)
    b2 = jax.random.uniform(k4, (h2,), jnp.float32, -bound2, bound2)
    return w1, b1, w2, b2


def reference_forward(x_nchw, w1, b1, w2, b2, num_layers):
    B = x_nchw.shape[0]
    pooled = jnp.mean(x_nchw.astype(jnp.float32), axis=(2, 3))   # (B, C)
    h = jnp.maximum(pooled @ w1 + b1, 0.0)
    out = h @ w2 + b2
    return out.reshape(B, num_layers, NUM_OPS)


if __name__ == "__main__":
    num_layers = 3
    inputch = 64
    B, Hsp, Wsp = 2, 16, 16

    key = jax.random.PRNGKey(0)
    kx, kp = jax.random.split(key)
    x = jax.random.normal(kx, (B, inputch, Hsp, Wsp), dtype=jnp.float32)
    w1, b1, w2, b2 = init_params(kp, inputch, num_layers)

    ref = reference_forward(x, w1, b1, w2, b2, num_layers)

    # 1) default tiling (single HW step at this small shape)
    out = jax.block_until_ready(expert_weight_gen(x, w1, b1, w2, b2, num_layers))
    assert out.shape == (B, num_layers, NUM_OPS), out.shape
    assert jnp.allclose(out, ref, atol=1e-4, rtol=1e-4), (
        float(jnp.max(jnp.abs(out - ref))))

    # 2) forced HW tiling (exercises the multi-step lane-resident accumulation)
    out2 = jax.block_until_ready(
        expert_weight_gen(x, w1, b1, w2, b2, num_layers, hw_tile=128))
    assert jnp.allclose(out2, ref, atol=1e-4, rtol=1e-4), (
        float(jnp.max(jnp.abs(out2 - ref))))

    # 3) non-128-divisible spatial size (exercises the exact zero-pad path)
    x3 = jax.random.normal(kx, (B, inputch, 10, 10), dtype=jnp.float32)
    ref3 = reference_forward(x3, w1, b1, w2, b2, num_layers)
    out3 = jax.block_until_ready(
        expert_weight_gen(x3, w1, b1, w2, b2, num_layers))
    assert jnp.allclose(out3, ref3, atol=1e-4, rtol=1e-4), (
        float(jnp.max(jnp.abs(out3 - ref3))))

    # 4) bf16 activation stream (halves the dominant HBM byte traffic)
    out4 = jax.block_until_ready(
        expert_weight_gen(x, w1, b1, w2, b2, num_layers, x_dtype=jnp.bfloat16))
    assert jnp.allclose(out4, ref, atol=2e-2, rtol=2e-2), (
        float(jnp.max(jnp.abs(out4 - ref))))

    print("KERNEL_OK")
</pallas_src>

<mosaic_0001>
module attributes {stable_mosaic.version = 11 : i64} {
  func.func @_expert_weight_gen_kernel(%arg0: i32, %arg1: i32, %arg2: memref<1x64x256xf32, #tpu.memory_space<vmem>>, %arg3: memref<64x128xf32, #tpu.memory_space<vmem>>, %arg4: memref<1x128xf32, #tpu.memory_space<vmem>>, %arg5: memref<128x128xf32, #tpu.memory_space<vmem>>, %arg6: memref<1x128xf32, #tpu.memory_space<vmem>>, %arg7: memref<1x1x128xf32, #tpu.memory_space<vmem>>, %arg8: memref<1x64x128xf32, #tpu.memory_space<vmem>>) attributes {dimension_semantics = [#tpu.dimension_semantics<parallel>, #tpu.dimension_semantics<arbitrary>], iteration_bounds = array<i64: 2, 1>, scalar_prefetch = 0 : i64, scratch_operands = 1 : i64, tpu.core_type = #tpu.core_type<tc>, window_params = [{transform_indices = @transform_0, window_bounds = array<i64: 1, 64, 256>}, {pipeline_mode = #tpu.pipeline_mode<synchronous>, transform_indices = @transform_1, window_bounds = array<i64: 64, 128>}, {pipeline_mode = #tpu.pipeline_mode<synchronous>, transform_indices = @transform_2, window_bounds = array<i64: 1, 128>}, {pipeline_mode = #tpu.pipeline_mode<synchronous>, transform_indices = @transform_3, window_bounds = array<i64: 128, 128>}, {pipeline_mode = #tpu.pipeline_mode<synchronous>, transform_indices = @transform_4, window_bounds = array<i64: 1, 128>}, {transform_indices = @transform_5, window_bounds = array<i64: 1, 1, 128>}]} {
    %c0_i32 = arith.constant 0 : i32
    %0 = arith.cmpi eq, %arg1, %c0_i32 : i32
    %1 = arith.extui %0 : i1 to i32
    %c0_i32_0 = arith.constant 0 : i32
    %2 = arith.cmpi ne, %1, %c0_i32_0 : i32
    scf.if %2 {
      %cst = arith.constant 0.000000e+00 : f32
      %12 = vector.broadcast %cst : f32 to vector<1x64x128xf32>
      %c0_13 = arith.constant 0 : index
      %c0_14 = arith.constant 0 : index
      %c0_15 = arith.constant 0 : index
      %13 = vector.load %arg8[%c0_13, %c0_14, %c0_15] : memref<1x64x128xf32, #tpu.memory_space<vmem>>, vector<1x64x128xf32>
      tpu.vector_store %arg8[%c0_13, %c0_14, %c0_15], %12 {strides = array<i32>} : memref<1x64x128xf32, #tpu.memory_space<vmem>>, vector<1x64x128xf32>,
    } else {
    }
    %c0 = arith.constant 0 : index
    %c0_1 = arith.constant 0 : index
    %c0_2 = arith.constant 0 : index
    %3 = vector.load %arg2[%c0, %c0_1, %c0_2] : memref<1x64x256xf32, #tpu.memory_space<vmem>>, vector<1x64x128xf32>
    %c0_3 = arith.constant 0 : index
    %c0_4 = arith.constant 0 : index
    %c128 = arith.constant 128 : index
    %4 = vector.load %arg2[%c0_3, %c0_4, %c128] : memref<1x64x256xf32, #tpu.memory_space<vmem>>, vector<1x64x128xf32>
    %5 = arith.addf %3, %4 : vector<1x64x128xf32>
    %c0_5 = arith.constant 0 : index
    %c0_6 = arith.constant 0 : index
    %c0_7 = arith.constant 0 : index
    %6 = vector.load %arg8[%c0_5, %c0_6, %c0_7] : memref<1x64x128xf32, #tpu.memory_space<vmem>>, vector<1x64x128xf32>
    %7 = arith.addf %6, %5 : vector<1x64x128xf32>
    %c0_8 = arith.constant 0 : index
    %c0_9 = arith.constant 0 : index
    %c0_10 = arith.constant 0 : index
    %8 = vector.load %arg8[%c0_8, %c0_9, %c0_10] : memref<1x64x128xf32, #tpu.memory_space<vmem>>, vector<1x64x128xf32>
    tpu.vector_store %arg8[%c0_8, %c0_9, %c0_10], %7 {strides = array<i32>} : memref<1x64x128xf32, #tpu.memory_space<vmem>>, vector<1x64x128xf32>,
    %c0_i32_11 = arith.constant 0 : i32
    %9 = arith.cmpi eq, %arg1, %c0_i32_11 : i32
    %10 = arith.extui %9 : i1 to i32
    %c0_i32_12 = arith.constant 0 : i32
    %11 = arith.cmpi ne, %10, %c0_i32_12 : i32
    scf.if %11 {
      %c0_13 = arith.constant 0 : index
      %c0_14 = arith.constant 0 : index
      %c0_15 = arith.constant 0 : index
      %12 = vector.load %arg8[%c0_13, %c0_14, %c0_15] : memref<1x64x128xf32, #tpu.memory_space<vmem>>, vector<1x64x128xf32>
      %cst = arith.constant dense<0.000000e+00> : vector<1x64xf32>
      %13 = vector.multi_reduction <add>, %12, %cst [2] : vector<1x64x128xf32> to vector<1x64xf32>
      %cst_16 = arith.constant 3.906250e-03 : f32
      %14 = vector.broadcast %cst_16 : f32 to vector<1x64xf32>
      %15 = arith.mulf %13, %14 : vector<1x64xf32>
      %c0_17 = arith.constant 0 : index
      %c0_18 = arith.constant 0 : index
      %16 = vector.load %arg3[%c0_17, %c0_18] : memref<64x128xf32, #tpu.memory_space<vmem>>, vector<64x128xf32>
      %cst_19 = arith.constant dense<0.000000e+00> : vector<1x128xf32>
      %17 = tpu.matmul %15, %16, %cst_19 {dimension_numbers = #tpu.dot_dimension_numbers<[1], [0], [0], [1], [0, 0, 1, 1], [], []>} : vector<1x64xf32>, vector<64x128xf32>, vector<1x128xf32> -> vector<1x128xf32>
      %c0_20 = arith.constant 0 : index
      %c0_21 = arith.constant 0 : index
      %18 = vector.load %arg4[%c0_20, %c0_21] : memref<1x128xf32, #tpu.memory_space<vmem>>, vector<1x128xf32>
      %19 = arith.addf %17, %18 : vector<1x128xf32>
      %cst_22 = arith.constant 0.000000e+00 : f32
      %20 = vector.broadcast %cst_22 : f32 to vector<1x128xf32>
      %21 = arith.maximumf %19, %20 : vector<1x128xf32>
      %c0_23 = arith.constant 0 : index
      %c0_24 = arith.constant 0 : index
      %22 = vector.load %arg5[%c0_23, %c0_24] : memref<128x128xf32, #tpu.memory_space<vmem>>, vector<128x128xf32>
      %cst_25 = arith.constant dense<0.000000e+00> : vector<1x128xf32>
      %23 = tpu.matmul %21, %22, %cst_25 {dimension_numbers = #tpu.dot_dimension_numbers<[1], [0], [0], [1], [0, 0, 1, 1], [], []>} : vector<1x128xf32>, vector<128x128xf32>, vector<1x128xf32> -> vector<1x128xf32>
      %c0_26 = arith.constant 0 : index
      %c0_27 = arith.constant 0 : index
      %24 = vector.load %arg6[%c0_26, %c0_27] : memref<1x128xf32, #tpu.memory_space<vmem>>, vector<1x128xf32>
      %25 = arith.addf %23, %24 : vector<1x128xf32>
      %26 = vector.shape_cast %25 : vector<1x128xf32> to vector<1x1x128xf32>
      %c0_28 = arith.constant 0 : index
      %c0_29 = arith.constant 0 : index
      %c0_30 = arith.constant 0 : index
      %27 = vector.load %arg7[%c0_28, %c0_29, %c0_30] : memref<1x1x128xf32, #tpu.memory_space<vmem>>, vector<1x1x128xf32>
      tpu.vector_store %arg7[%c0_28, %c0_29, %c0_30], %26 {strides = array<i32>} : memref<1x1x128xf32, #tpu.memory_space<vmem>>, vector<1x1x128xf32>,
    } else {
    }
    return
  }
  func.func @transform_0(%arg0: i32, %arg1: i32) -> (i32, i32, i32) {
    %c0_i32 = arith.constant 0 : i32
    %c0_i32_0 = arith.constant 0 : i32
    return %arg0, %c0_i32, %arg1 : i32, i32, i32
  }
  func.func @transform_1(%arg0: i32, %arg1: i32) -> (i32, i32) {
    %c0_i32 = arith.constant 0 : i32
    %c0_i32_0 = arith.constant 0 : i32
    %c0_i32_1 = arith.constant 0 : i32
    return %c0_i32, %c0_i32_0 : i32, i32
  }
  func.func @transform_2(%arg0: i32, %arg1: i32) -> (i32, i32) {
    %c0_i32 = arith.constant 0 : i32
    %c0_i32_0 = arith.constant 0 : i32
    %c0_i32_1 = arith.constant 0 : i32
    return %c0_i32, %c0_i32_0 : i32, i32
  }
  func.func @transform_3(%arg0: i32, %arg1: i32) -> (i32, i32) {
    %c0_i32 = arith.constant 0 : i32
    %c0_i32_0 = arith.constant 0 : i32
    %c0_i32_1 = arith.constant 0 : i32
    return %c0_i32, %c0_i32_0 : i32, i32
  }
  func.func @transform_4(%arg0: i32, %arg1: i32) -> (i32, i32) {
    %c0_i32 = arith.constant 0 : i32
    %c0_i32_0 = arith.constant 0 : i32
    %c0_i32_1 = arith.constant 0 : i32
    return %c0_i32, %c0_i32_0 : i32, i32
  }
  func.func @transform_5(%arg0: i32, %arg1: i32) -> (i32, i32, i32) {
    %c0_i32 = arith.constant 0 : i32
    %c0_i32_0 = arith.constant 0 : i32
    %c0_i32_1 = arith.constant 0 : i32
    return %arg0, %c0_i32, %c0_i32_0 : i32, i32, i32
  }
}

</mosaic_0001>

<bundles_post_ra>
// kernel: tpu_custom_call.1
= control target key start
LH: loop header
LB: loop body
LE: loop exit
PB: predicated region body
PF: predicated region fallthrough
CT: control target
= control target key end

     0   :  { %s1105_s0 = inlined_call_operand.hbm [shape: f32[2,64,256], index: 0, kind: input, shape index: {}]   ;;  %s1106_s1 = inlined_call_operand.hbm [shape: f32[64,128], index: 1, kind: input, shape index: {}]   ;;  %s1107_s2 = inlined_call_operand.vmem [shape: f32[1,128], index: 2, kind: input, shape index: {}]   ;;  %s1108_s3 = inlined_call_operand.hbm [shape: f32[128,128], index: 3, kind: input, shape index: {}]   ;;  %s1109_s4 = inlined_call_operand.vmem [shape: f32[1,128], index: 4, kind: input, shape index: {}]   ;;  %s1110_s5 = inlined_call_operand.hbm [shape: f32[2,1,128], index: 5, kind: output, shape index: {}]  }
   0x1   :  { %1112 = sst [smem:[#allocation14_spill]] %s1106_s1 }
   0x2   :  { %1113 = sst [smem:[#allocation15_spill]] %s1108_s3 }
   0x3   :  { %10 = vsyncpa [#allocation4], 0 }
   0x4   :  { %12 = vsyncpa [#allocation4 + $0x1], 0 }
   0x5   :  { %13 = vsyncpa [#allocation7], 0 }
   0x6   :  { %14 = vsyncpa [#allocation5], 0 }
   0x7   :  { %16 = vsyncpa [#allocation5 + $0x1], 0  ;;  %s926_s18 = smov 0   ;;  %s928_s19 = smov 0  }
   0x8   :  { %s930_s20 = smov 0   ;;  %s932_s21 = smov 0  }
   0x9   :  { %s934_s22 = smov 0   ;;  %s936_s23 = smov 0  }
   0xa LB: > { %s608_s24 = sadd.s32 4294967295, %s888_s23   ;;  %s609_s25 = sadd.s32 4294967294, %s888_s23   ;;  %s888_s23 = sphi %s936_s23, %s22_s23   ;;  %s884_s22 = sphi %s934_s22, %s1129_s22   ;;  %s880_s21 = sphi %s932_s21, %s1128_s21   ;;  %s876_s20 = sphi %s930_s20, %s1127_s20   ;;  %s872_s19 = sphi %s928_s19, %s1126_s19   ;;  %s868_s18 = sphi %s926_s18, %s1125_s18  }
   0xb   : > { %p56_p0 = scmp.ne.s32.totalorder %s872_s19, %s868_s18  ;;  %p960_p1 = scmp.eq.s32.totalorder %s608_s24, 0 }
   0xc   : > { %p964_p2 = scmp.eq.s32.totalorder %s608_s24, 1  ;;  %p170_p3 = scmp.eq.s32.totalorder %s609_s25, 1 }
   0xd   : > { %p970_p4 = por %p960_p1, %p56_p0  ;;  %p610_p5 = scmp.ge.s32.totalorder %s888_s23, 1 }
   0xe   : > { %p975_p6 = por %p170_p3, %p56_p0  ;;  %p177_p7 = scmp.lt.s32.totalorder %s888_s23, 3 }
   0xf   : > { %s1118_s1 = sld [smem:[#allocation14_spill]]  ;;  %s890_s9 = smov [#allocation6]  }
  0x10   : > { %p983_p8 = pnand %p610_p5, %p177_p7  ;;  %s190_s10 = sshll.u32 %s890_s9, 4  ;;  %s191_s10 = int_to_ptr.vmem [resolvable:$true] %s190_s10 }
  0x11   : > { %p613_p11 = scmp.ge.s32.totalorder %s888_s23, 2  ;;  %s1120_s3 = sld [smem:[#allocation15_spill]] }
  0x12   : > { %p637_p9 = pneg %p983_p8  ;;  %s891_s14 = smov 128  }
  0x13   : > { %s892_s15 = smov 8   ;;  %s893_s16 = smov [#allocation8]  }
  0x14   : > { %p638_p10 = pnand %p637_p9, %p960_p1  ;;  %s207_s17 = sshll.u32 %s893_s16, 4  ;;  %s208_s17 = int_to_ptr.vmem [resolvable:$true] %s207_s17 }
  0x15   : > { %s188_s7 = sshll.u32 %s1118_s1, 4  ;;  %s34_s24 = sadd.s32 1, %s884_s22  ;;  %s189_s7 = int_to_ptr.hbm [resolvable:$true] %s188_s7 }
  0x16   : > { %640 = dma.hbm_to_vmem [thread:$0]  (!%p638_p10), %s189_s7, 1024, %s191_s10, [#allocation7], %s891_s14, %s891_s14, %s892_s15  }
  0x17   : > { %s205_s13 = sshll.u32 %s1120_s3, 4  ;;  %s43_s25 = sadd.s32 1, %s876_s20  ;;  %s206_s13 = int_to_ptr.hbm [resolvable:$true] %s205_s13 }
  0x18   : > { %643 = dma.hbm_to_vmem [thread:$0]  (!%p638_p10), %s206_s13, 2048, %s208_s17, [#allocation7], %s891_s14, %s891_s14, %s892_s15  }
  0x19   : > { %p36_p12 = scmp.ge.s32.totalorder %s34_s24, 2  ;;  %p50_p13 = scmp.ne.s32.totalorder %s876_s20, %s872_s19 }
  0x1a   : > { %p51_p0 = scmp.eq.s32.totalorder %s888_s23, 0  ;;  %p654_p3 = scmp.lt.s32.totalorder %s888_s23, 2 }
  0x1b   : > { %s1131_s24 = smov (%p36_p12, %s34_s24), 0  ;;  %p1009_p7 = por %p964_p2, %p50_p13 }
  0x1c   : > { %1121 = sst [smem:[#allocation13_spill]] %s1131_s24  ;;  %p1003_p5 = por %p51_p0, %p50_p13 }
  0x1d   : > { %s38_s7 = ssub.s32 %s884_s22, %s1131_s24  ;;  %s224_s9 = sand.u32 1, %s876_s20  }
  0x1e   : > { %p41_p9 = scmp.eq.s32.totalorder %s38_s7, 0  ;;  %s614_s10 = sshll.u32 %s224_s9, 7 }
  0x1f   : > { %s624_s11 = sshll.u32 %s884_s22, 7  ;;  %s228_s17 = scalar_lea.vmem [#allocation3], %s614_s10 }
  0x20   : > { %s1018_s12 = scalar_select %p41_p9, %s876_s20, %s43_s25  }
  0x21   : > { %s235_s15 = scalar_lea.hbm %s1105_s0, %s624_s11  ;;  %s238_s1 = sshll.u32 %s228_s17, 4  ;;  %s239_s1 = int_to_ptr.vmem [resolvable:$true] %s238_s1 }
  0x22   : > { %s236_s16 = sshll.u32 %s235_s15, 4  ;;  %p645_p2 = pnand %p654_p3, %p1003_p5  ;;  %s237_s16 = int_to_ptr.hbm [resolvable:$true] %s236_s16 }
  0x23   : > { %s225_s27 = scalar_lea.sflag [#allocation4], %s224_s9  ;;  %s894_s3 = smov 256  }
  0x24   : > { %s895_s24 = smov 16   ;;  %250 = sbr.rel (%p983_p8) target bundleno = 446 (0x1be), region = 40 }
  0x25   : > { %647 = dma.hbm_to_vmem [thread:$0]  (!%p645_p2), %s237_s16, 2048, %s239_s1, %s225_s27, %s894_s3, %s894_s3, %s895_s24  }
  0x26   : > { %s1030_s25 = sand.u32 (!%p983_p8), 1, %s872_s19  }
  0x27   : > { %s618_s7 = sshll.u32 (!%p983_p8), %s1030_s25, 7  ;;  %s253_s10 = scalar_lea.sflag (!%p983_p8), [#allocation4], %s1030_s25 }
  0x28   : > { %s1034_s11 = scalar_lea.vmem (!%p983_p8), [#allocation3], %s618_s7 }
  0x29   : > { %855 = dma.done.wait (%p970_p4), %s253_s10, 2048  }
  0x2a   : > { %857 = vsyncadd (%p970_p4), %s253_s10, 4294965248 }
  0x2b   : > { %859 = dma.done.wait (%p960_p1), [#allocation7], 3072  }
  0x2c   : > { %861 = vsyncadd (%p960_p1), [#allocation7], 4294964224  ;;  %v306_v0 = vld [vmem:[%s1034_s11] sm:$0xff]  ;;  %v314_v1 = vld [vmem:[%s1034_s11 + $0x8] sm:$0xff]  ;;  %v406_v38 = vlaneseq  ;;  %vm411_vm0 = vcmask 130112   ;;  %vm415_vm1 = vcmask 195712   ;;  %s508_s8 = scalar_lea.hbm %s1110_s5, %s880_s21 }
  0x2d   : > { %v308_v2 = vld [vmem:[%s1034_s11 + $0x20] sm:$0xff]  ;;  %v322_v3 = vadd.f32 %v314_v1, %v306_v0  ;;  %v316_v4 = vld [vmem:[%s1034_s11 + $0x28] sm:$0xff]  ;;  %v307_v9 = vld [vmem:[%s1034_s11 + $0x10] sm:$0xff]  ;;  %vm419_vm2 = vcmask 261312   ;;  %vm423_vm3 = vcmask 326912   ;;  %vm427_vm4 = vcmask 392512  }
  0x2e   : > { %v310_v5 = vld [vmem:[%s1034_s11 + $0x40] sm:$0xff]  ;;  %v318_v6 = vld [vmem:[%s1034_s11 + $0x48] sm:$0xff]  ;;  %v324_v7 = vadd.f32 %v316_v4, %v308_v2  ;;  %v315_v10 = vld [vmem:[%s1034_s11 + $0x18] sm:$0xff]  ;;  %v407_v44 = vand.u32 127, %v406_v38  ;;  %vm431_vm5 = vcmask 458112   ;;  %vm435_vm6 = vcmask 523712  }
  0x2f   : > { %v326_v8 = vadd.f32 %v318_v6, %v310_v5  ;;  %365 = vadd.xlane.f32.xlu0 %v322_v3  ;;  %v309_v11 = vld [vmem:[%s1034_s11 + $0x30] sm:$0xff]  ;;  %v317_v12 = vld [vmem:[%s1034_s11 + $0x38] sm:$0xff]  ;;  %v323_v15 = vadd.f32 %v315_v10, %v307_v9  ;;  %v312_v18 = vld [vmem:[%s1034_s11 + $0x60] sm:$0xff]  ;;  %vm437_vm7 = vcmask 523264   ;;  %s292_s9 = scalar_lea.vmem [#allocation9], %s1030_s25  ;;  %s512_s14 = sshll.u32 %s508_s8, 4  ;;  %s513_s14 = int_to_ptr.hbm [resolvable:$true] %s512_s14 }
  0x30   : > { %369 = vadd.xlane.f32.xlu1 %v324_v7  ;;  %v311_v13 = vld [vmem:[%s1034_s11 + $0x50] sm:$0xff]  ;;  %v319_v14 = vld [vmem:[%s1034_s11 + $0x58] sm:$0xff]  ;;  %v325_v16 = vadd.f32 %v317_v12, %v309_v11  ;;  %v320_v19 = vld [vmem:[%s1034_s11 + $0x68] sm:$0xff]  ;;  %v409_v47 = vadd.s32 4294967288, %v407_v44  ;;  %v413_v49 = vadd.s32 4294967280, %v407_v44  ;;  %v417_v52 = vadd.s32 4294967272, %v407_v44 }
  0x31   : > { %373 = vadd.xlane.f32.xlu2 %v326_v8  ;;  %v327_v17 = vadd.f32 %v319_v14, %v311_v13  ;;  %v313_v20 = vld [vmem:[%s1034_s11 + $0x70] sm:$0xff]  ;;  %v321_v21 = vld [vmem:[%s1034_s11 + $0x78] sm:$0xff]  ;;  %v328_v22 = vadd.f32 %v320_v19, %v312_v18  ;;  %v394_v26 = vld [vmem:[#allocation6 + $0x28] sm:$0xff]  ;;  %v421_v57 = vadd.s32 4294967264, %v407_v44  ;;  %v425_v1 = vadd.s32 4294967256, %v407_v44  ;;  %s510_s13 = sshll.u32 %s292_s9, 4  ;;  %s511_s13 = int_to_ptr.vmem [resolvable:$true] %s510_s13 }
  0x32   : > { %v329_v23 = vadd.f32 %v321_v21, %v313_v20  ;;  %v396_v24 = vld [vmem:[#allocation6 + $0x38] sm:$0xff]  ;;  %v395_v25 = vld [vmem:[#allocation6 + $0x30] sm:$0xff]  ;;  %v393_v27 = vld [vmem:[#allocation6 + $0x20] sm:$0xff]  ;;  %v429_v8 = vadd.s32 4294967248, %v407_v44  ;;  %v433_v11 = vadd.s32 4294967240, %v407_v44  ;;  %s500_s15 = scalar_lea.sflag [#allocation5], %s1030_s25 }
  0x33   : > { %448 = vmatpush.msra.mxu0 %v396_v24  ;;  %v392_v28 = vld [vmem:[#allocation6 + $0x18] sm:$0xff]  ;;  %v391_v29 = vld [vmem:[#allocation6 + $0x10] sm:$0xff]  ;;  %v390_v30 = vld [vmem:[#allocation6 + $0x8] sm:$0xff]  ;;  %s816_s16 = sshra.s32 %s513_s14, 4  ;;  %s822_s7 = scalar_lea.hbm %s1110_s5, 2  ;;  %s817_s16 = int_to_ptr.hbm [resolvable:$true] %s816_s16 }
  0x34   : > { %v389_v31 = vld [vmem:[#allocation6] sm:$0xff]  ;;  %v476_v32 = vld [vmem:[#allocation8 + $0x78] sm:$0xff]  ;;  %v475_v33 = vld [vmem:[#allocation8 + $0x70] sm:$0xff]  ;;  %s818_s17 = scalar_lea.hbm %s817_s16, 1  ;;  %p823_p10 = scmp.lt.s32.totalorder %s817_s16, %s1110_s5 }
  0x35   : > { %449 = vmatpush.msra.mxu0 %v395_v25  ;;  %478 = vmatpush.msra.mxu1 %v476_v32  ;;  %v474_v34 = vld [vmem:[#allocation8 + $0x68] sm:$0xff]  ;;  %v473_v35 = vld [vmem:[#allocation8 + $0x60] sm:$0xff]  ;;  %v472_v36 = vld [vmem:[#allocation8 + $0x58] sm:$0xff]  ;;  %p819_p1 = scmp.ne.s32.totalorder %s817_s16, %s818_s17  ;;  %p824_p12 = scmp.lt.s32.totalorder %s822_s7, %s818_s17 }
  0x36   : > { %v471_v37 = vld [vmem:[#allocation8 + $0x50] sm:$0xff]  ;;  %v470_v42 = vld [vmem:[#allocation8 + $0x48] sm:$0xff]  ;;  %v469_v43 = vld [vmem:[#allocation8 + $0x40] sm:$0xff] }
  0x37   : > { %367 = vadd.xlane.f32.xlu0 %v323_v15  ;;  %450 = vmatpush.msra.mxu0 %v394_v26  ;;  %v468_v45 = vld [vmem:[#allocation8 + $0x38] sm:$0xff]  ;;  %v467_v48 = vld [vmem:[#allocation8 + $0x30] sm:$0xff]  ;;  %v466_v56 = vld [vmem:[#allocation8 + $0x28] sm:$0xff]  ;;  %p820_p4 = pnand %p819_p1, %p1009_p7  ;;  %p825_p13 = por %p824_p12, %p823_p10 }
  0x38   : > { %371 = vadd.xlane.f32.xlu1 %v325_v16  ;;  %479 = vmatpush.msra.mxu1 %v475_v33  ;;  %v465_v62 = vld [vmem:[#allocation8 + $0x20] sm:$0xff]  ;;  %v464_v4 = vld [vmem:[#allocation8 + $0x18] sm:$0xff]  ;;  %v463_v21 = vld [vmem:[#allocation8 + $0x10] sm:$0xff] }
  0x39   : > { %375 = vadd.xlane.f32.xlu2 %v327_v17  ;;  %451 = vmatpush.msra.mxu0 %v393_v27  ;;  %v397_v24 = vld [vmem:[%s1107_s2] sm:$0x1]  ;;  %p821_p8 = pneg %p820_p4 }
  0x3a   : > { %480 = vmatpush.msra.mxu1 %v474_v34 }
  0x3b   : > { %452 = vmatpush.msra.mxu0 %v392_v28  ;;  %v477_v28 = vld [vmem:[%s1109_s4] sm:$0x1]  ;;  %p826_p0 = pnand %p825_p13, %p821_p8 }
  0x3c   : > { %481 = vmatpush.msra.mxu1 %v473_v35 }
  0x3d   : > { %453 = vmatpush.msra.mxu0 %v391_v29 }
  0x3e   : > { %482 = vmatpush.msra.mxu1 %v472_v36 }
  0x3f   : > { %377 = vadd.xlane.f32.xlu0 %v328_v22  ;;  %454 = vmatpush.msra.mxu0 %v390_v30  ;;  %v462_v22 = vld [vmem:[#allocation8 + $0x8] sm:$0xff] }
  0x40   : > { %379 = vadd.xlane.f32.xlu1 %v329_v23  ;;  %483 = vmatpush.msra.mxu1 %v471_v37  ;;  %v461_v23 = vld [vmem:[#allocation8] sm:$0xff] }
  0x41   : > { %455 = vmatpush.msra.mxu0 %v389_v31 }
  0x42   : > { %484 = vmatpush.msra.mxu1 %v470_v42 }
  0x44   : > { %485 = vmatpush.msra.mxu1 %v469_v43 }
  0x46   : > { %486 = vmatpush.msra.mxu1 %v468_v45 }
  0x48   : > { %487 = vmatpush.msra.mxu1 %v467_v48 }
  0x4a   : > { %488 = vmatpush.msra.mxu1 %v466_v56 }
  0x4c   : > { %489 = vmatpush.msra.mxu1 %v465_v62 }
  0x4e   : > { %490 = vmatpush.msra.mxu1 %v464_v4 }
  0x50   : > { %491 = vmatpush.msra.mxu1 %v463_v21 }
  0x52   : > { %492 = vmatpush.msra.mxu1 %v462_v22 }
  0x54   : > { %493 = vmatpush.msra.mxu1 %v461_v23 }
  0xa2   : > { %v366_v39 = vpop.xlane.xlu0 %365 }
  0xa3   : > { %v370_v40 = vpop.xlane.xlu1 %369  ;;  %v381_v46 = vmul.f32 0.00390625, %v366_v39 }
  0xa4   : > { %v374_v41 = vpop.xlane.xlu2 %373  ;;  %v383_v50 = vmul.f32 0.00390625, %v370_v40 }
  0xa5   : > { %v408_v59 = vperm.slane %v381_v46, %v407_v44  ;;  %v385_v60 = vmul.f32 0.00390625, %v374_v41 }
  0xa6   : > { %v414_v63 = vperm.slane %v383_v50, %v413_v49 }
  0xa7   : > { %v422_v6 = vperm.slane %v385_v60, %v421_v57 }
  0xaa   : > { %v368_v51 = vpop.xlane.xlu0 %367 }
  0xab   : > { %v382_v53 = vmul.f32 0.00390625, %v368_v51  ;;  %v372_v54 = vpop.xlane.xlu1 %371 }
  0xac   : > { %v376_v55 = vpop.xlane.xlu2 %375  ;;  %v384_v58 = vmul.f32 0.00390625, %v372_v54 }
  0xad   : > { %v410_v61 = vperm.slane %v382_v53, %v409_v47  ;;  %v386_v2 = vmul.f32 0.00390625, %v376_v55 }
  0xae   : > { %v418_v0 = vperm.slane %v384_v58, %v417_v52 }
  0xaf   : > { %v412_v3 = vsel %vm411_vm0, %v410_v61, %v408_v59  ;;  %v426_v9 = vperm.slane %v386_v2, %v425_v1 }
  0xb0   : > { %v416_v5 = vsel %vm415_vm1, %v414_v63, %v412_v3 }
  0xb1   : > { %v420_v7 = vsel %vm419_vm2, %v418_v0, %v416_v5 }
  0xb2   : > { %v378_v10 = vpop.xlane.xlu0 %377  ;;  %v424_v14 = vsel %vm423_vm3, %v422_v6, %v420_v7 }
  0xb3   : > { %v387_v12 = vmul.f32 0.00390625, %v378_v10  ;;  %v380_v13 = vpop.xlane.xlu1 %379  ;;  %v428_v18 = vsel %vm427_vm4, %v426_v9, %v424_v14 }
  0xb4   : > { %v388_v15 = vmul.f32 0.00390625, %v380_v13 }
  0xb5   : > { %v430_v16 = vperm.slane %v387_v12, %v429_v8 }
  0xb6   : > { %v434_v17 = vperm.slane %v388_v15, %v433_v11 }
  0xb7   : > { %v432_v19 = vsel %vm431_vm5, %v430_v16, %v428_v18 }
  0xb8   : > { %v436_v20 = vsel %vm435_vm6, %v434_v17, %v432_v19 }
  0xb9   : > { %621 = vmatmul.msk.f32.vlgmr.msra.gmra.mxu0 %vm437_vm7, %v436_v20 }
 0x136   : > { %v457_v25 = vpop.f32.mrf.mxu0 }
 0x137   : > { %v458_v26 = vadd.f32 %v457_v25, %v397_v24 }
 0x139   : > { %v460_v27 = vmax.f32 %v458_v26, 0.0 }
 0x13b   : > { %494 = vmatmul.f32.vlgmr.msra.gmra.mxu1 %v460_v27 }
 0x1b8   : > { %v495_v29 = vpop.f32.mrf.mxu1 }
 0x1b9   : > { %v496_v30 = vadd.f32 %v495_v29, %v477_v28 }
 0x1bb   : > { %498 = vst [vmem:[%s292_s9] sm:$0x1] %v496_v30 }
 0x1bc   : > { %829 = shalt.err (!%p826_p0)
}
 0x1bd   : > { %635 = dma.vmem_to_hbm [thread:$0]  (%p1009_p7), %s511_s13, 16, %s513_s14, %s500_s15  }
 0x1be PF: > { %s524_s25 = sand.u32 1, %s868_s18   ;;  %p649_p3 = pnand %p613_p11, %p975_p6 }
 0x1bf   : > { %s525_s1 = scalar_lea.sflag [#allocation5], %s524_s25 }
 0x1c0   : > { %p650_p5 = pneg %p649_p3 }
 0x1c2   : > { %863 = dma.done.wait (%p650_p5), %s525_s1, 16  }
 0x1c3   : > { %865 = vsyncadd (%p650_p5), %s525_s1, 4294967280  ;;  %s22_s23 = sadd.s32 1, %s888_s23   ;;  %s1124_s6 = sld [smem:[#allocation13_spill]] }
 0x1c4   : > { %p19_p9 = scmp.ge.s32.totalorder %s22_s23, 4   ;;  %s1125_s18 = smov %s872_s19 }
 0x1c5   : > { %s1126_s19 = smov %s876_s20  ;;  %s1127_s20 = smov %s1018_s12 }
 0x1c6   : > { %s1128_s21 = smov %s884_s22  ;;  %21 = sbr.rel (!%p19_p9) target bundleno = 10 (0xa), region = 101 }
 0x1c9   : > { %s1129_s22 = smov %s1124_s6 }
 0x1cb   :  { %530 = vsyncpa [#allocation4], 1 }
 0x1cc   :  { %532 = vsyncpa [#allocation4 + $0x1], 1 }
 0x1cd   :  { %533 = vsyncpa [#allocation7], 1 }
 0x1ce   :  { %534 = vsyncpa [#allocation5], 1 }
 0x1cf   :  { %536 = vsyncpa [#allocation5 + $0x1], 1 }

</bundles_post_ra>
